<compile_context>
chip_gen: v7x
topology: tpu7x:2x2x1
jax: 0.10.0
libtpu: 0.0.40
codegen_flags: <defaults>
</compile_context>

<pallas_src>
import functools

import jax
import jax.numpy as jnp
from jax.experimental import pallas as pl
from jax.experimental.pallas import tpu as pltpu


_VMEM_LIMIT = 32 * 1024 * 1024          # safe on v5e/v6e/v7x; tiles are small

# Tile candidates: second-to-last block dims multiples of 8, last dims
# multiples of 128 (or equal to the full array extent -> fallback).
_M_TILES = (512, 256, 128, 64, 32, 16, 8)
_LANE_TILES = (512, 256, 128)


def _pick_tile(dim, candidates):
    """Largest candidate that exactly divides `dim`, else the full extent."""
    for c in candidates:
        if dim % c == 0:
            return c
    return dim      # full-extent block is always layout-legal


def _pick_token_block(n, l, d3, budget_bytes=2 * 1024 * 1024):
    """Largest multiple-of-8 divisor of n whose (l, nb, d3) bf16 block fits."""
    cap = max(8, min(128, budget_bytes // max(1, l * d3 * 2)))
    for c in range(min(n, cap), 7, -1):
        if c % 8 == 0 and n % c == 0:
            return c
    return n


# ----------------------------- Pallas kernels -----------------------------

def _linear_kernel(x_ref, w_ref, b_ref, o_ref, acc_ref, *, relu):
    """Tiled matmul, fp32 VMEM accumulator; bias (+ReLU) epilogue at k==last."""
    @pl.when(pl.program_id(2) == 0)
    def _():
        acc_ref[...] = jnp.zeros_like(acc_ref)

    acc_ref[...] += jnp.dot(x_ref[...], w_ref[...],
                            preferred_element_type=jnp.float32)

    @pl.when(pl.program_id(2) == pl.num_programs(2) - 1)
    def _():
        y = acc_ref[...] + b_ref[...]
        if relu:
            y = jnp.maximum(y, 0.0)
        o_ref[...] = y.astype(o_ref.dtype)


def linear(x, w, b, relu=False, out_dtype=jnp.bfloat16):
    """x: (M, K) bf16, w: (K, N) bf16, b: (N,) f32 -> (M, N) out_dtype."""
    M, K = x.shape
    K2, N = w.shape
    assert K == K2
    tm = _pick_tile(M, _M_TILES)
    tn = _pick_tile(N, _LANE_TILES)
    tk = _pick_tile(K, _LANE_TILES)
    grid = (M // tm, N // tn, K // tk)
    return pl.pallas_call(
        functools.partial(_linear_kernel, relu=relu),
        out_shape=jax.ShapeDtypeStruct((M, N), out_dtype),
        grid=grid,
        in_specs=[
            pl.BlockSpec((tm, tk), lambda i, j, k: (i, k)),
            pl.BlockSpec((tk, tn), lambda i, j, k: (k, j)),
            pl.BlockSpec((1, tn), lambda i, j, k: (0, j)),
        ],
        out_specs=pl.BlockSpec((tm, tn), lambda i, j, k: (i, j)),
        scratch_shapes=[pltpu.VMEM((tm, tn), jnp.float32)],
        compiler_params=pltpu.CompilerParams(
            dimension_semantics=("parallel", "parallel", "arbitrary"),
            vmem_limit_bytes=_VMEM_LIMIT),
    )(x, w, b.reshape(1, N))


def _linear_add_ln_kernel(x_ref, w_ref, b_ref, r_ref, g_ref, be_ref,
                          o_ref, acc_ref, *, eps):
    """Fused: y = LayerNorm(x @ w + b + residual), stored in o_ref dtype."""
    @pl.when(pl.program_id(1) == 0)
    def _():
        acc_ref[...] = jnp.zeros_like(acc_ref)

    acc_ref[...] += jnp.dot(x_ref[...], w_ref[...],
                            preferred_element_type=jnp.float32)

    @pl.when(pl.program_id(1) == pl.num_programs(1) - 1)
    def _():
        z = acc_ref[...] + b_ref[...] + r_ref[...].astype(jnp.float32)
        mean = jnp.mean(z, axis=-1, keepdims=True)
        cent = z - mean
        var = jnp.mean(cent * cent, axis=-1, keepdims=True)
        y = cent * jax.lax.rsqrt(var + eps) * g_ref[...] + be_ref[...]
        o_ref[...] = y.astype(o_ref.dtype)


def linear_add_layernorm(x, w, b, res, gamma, beta, eps=1e-5):
    """x: (M, K) bf16, w: (K, D) bf16, res: (M, D) bf16 -> bf16 LN(x@w+b+res)."""
    M, K = x.shape
    K2, D = w.shape
    assert K == K2 and res.shape == (M, D)
    tm = _pick_tile(M, _M_TILES)
    tk = _pick_tile(K, _LANE_TILES)
    grid = (M // tm, K // tk)
    return pl.pallas_call(
        functools.partial(_linear_add_ln_kernel, eps=eps),
        out_shape=jax.ShapeDtypeStruct((M, D), jnp.bfloat16),
        grid=grid,
        in_specs=[
            pl.BlockSpec((tm, tk), lambda i, k: (i, k)),
            pl.BlockSpec((tk, D), lambda i, k: (k, 0)),
            pl.BlockSpec((1, D), lambda i, k: (0, 0)),
            pl.BlockSpec((tm, D), lambda i, k: (i, 0)),
            pl.BlockSpec((1, D), lambda i, k: (0, 0)),
            pl.BlockSpec((1, D), lambda i, k: (0, 0)),
        ],
        out_specs=pl.BlockSpec((tm, D), lambda i, k: (i, 0)),
        scratch_shapes=[pltpu.VMEM((tm, D), jnp.float32)],
        compiler_params=pltpu.CompilerParams(
            dimension_semantics=("parallel", "arbitrary"),
            vmem_limit_bytes=_VMEM_LIMIT),
    )(x, w, b.reshape(1, D), res, gamma.reshape(1, D), beta.reshape(1, D))


def _attn_kernel(qkv_ref, o_ref, *, heads, scale):
    """All heads of a block of tokens; (L, nb, 3D) in -> lane-dense (L, nb, D) out.

    The image axis L (the transformer 'sequence' in the batch_first=False
    quirk) is tiny, so the batch-axis swap is done in-VMEM here rather than as
    a full-slab HBM transpose in the wrapper.
    """
    blk = jnp.transpose(qkv_ref[...], (1, 0, 2))      # (nb, L, 3D) bf16, in-VMEM
    d3 = blk.shape[-1]
    D = d3 // 3
    hd = D // heads
    outs = []
    for h in range(heads):                            # static unroll over heads
        q = blk[..., h * hd:(h + 1) * hd]
        k = blk[..., D + h * hd:D + (h + 1) * hd]
        v = blk[..., 2 * D + h * hd:2 * D + (h + 1) * hd]
        s = jax.lax.dot_general(q, k, (((2,), (2,)), ((0,), (0,))),
                                preferred_element_type=jnp.float32) * scale
        m = jnp.max(s, axis=-1, keepdims=True)
        p = jnp.exp(s - m)
        p = p * pl.reciprocal(jnp.sum(p, axis=-1, keepdims=True), approx=True)
        outs.append(jax.lax.dot_general(p.astype(blk.dtype), v,
                                        (((2,), (1,)), ((0,), (0,))),
                                        preferred_element_type=jnp.float32))
    out = jnp.concatenate(outs, axis=-1)              # (nb, L, D) f32
    o_ref[...] = jnp.transpose(out, (1, 0, 2)).astype(o_ref.dtype)


def attention(qkv, heads, scale):
    """qkv: (L, N, 3D) bf16 -> (L, N, D) bf16; grid over the token axis N."""
    L, N, d3 = qkv.shape
    D = d3 // 3
    nb = _pick_token_block(N, L, d3)
    grid = (N // nb,)
    return pl.pallas_call(
        functools.partial(_attn_kernel, heads=heads, scale=scale),
        out_shape=jax.ShapeDtypeStruct((L, N, D), jnp.bfloat16),
        grid=grid,
        in_specs=[pl.BlockSpec((L, nb, d3), lambda i: (0, i, 0))],
        out_specs=pl.BlockSpec((L, nb, D), lambda i: (0, i, 0)),
        compiler_params=pltpu.CompilerParams(
            dimension_semantics=("parallel",),
            vmem_limit_bytes=_VMEM_LIMIT),
    )(qkv)


# --------------------------- pure-JAX references ---------------------------
# (same bf16 activation quantization points as the kernels so tolerances
#  stay tight)

def _linear_ref(x, w, b, relu=False, out_dtype=jnp.bfloat16):
    y = jnp.dot(x, w, preferred_element_type=jnp.float32) + b
    if relu:
        y = jnp.maximum(y, 0.0)
    return y.astype(out_dtype)


def _linear_add_ln_ref(x, w, b, res, g, beta, eps=1e-5):
    z = (jnp.dot(x, w, preferred_element_type=jnp.float32)
         + b + res.astype(jnp.float32))
    m = z.mean(-1, keepdims=True)
    v = ((z - m) ** 2).mean(-1, keepdims=True)
    return ((z - m) * jax.lax.rsqrt(v + eps) * g + beta).astype(jnp.bfloat16)


def _attn_ref(qkv, heads, scale):
    L, N, d3 = qkv.shape
    D = d3 // 3
    hd = D // heads
    blk = jnp.transpose(qkv, (1, 0, 2))               # (N, L, 3D)
    outs = []
    for h in range(heads):
        q = blk[..., h * hd:(h + 1) * hd]
        k = blk[..., D + h * hd:D + (h + 1) * hd]
        v = blk[..., 2 * D + h * hd:2 * D + (h + 1) * hd]
        s = jnp.einsum("nqd,nkd->nqk", q, k,
                       preferred_element_type=jnp.float32) * scale
        m = jnp.max(s, axis=-1, keepdims=True)
        p = jnp.exp(s - m)
        p = p / jnp.sum(p, axis=-1, keepdims=True)
        outs.append(jnp.einsum("nqk,nkd->nqd", p.astype(qkv.dtype), v,
                               preferred_element_type=jnp.float32))
    out = jnp.concatenate(outs, axis=-1)
    return jnp.transpose(out, (1, 0, 2)).astype(jnp.bfloat16)


# ------------------------------- parameters --------------------------------

def init_params(key, *, patch_dim, dim, heads, depth, mlp_dim, num_classes):
    keys = iter(jax.random.split(key, 8 + depth * 12))

    def rnd(shape, scale=0.02):
        return (scale * jax.random.normal(next(keys), shape)).astype(jnp.float32)

    def rndw(shape):                 # matmul weights stored bf16 (MXU operands)
        return rnd(shape).astype(jnp.bfloat16)

    params = {
        "patch_w": rndw((patch_dim, dim)),        # stored as (in, out) = W^T
        "patch_b": rnd((dim,)),
        # cls_token is torch.zeros in the reference __init__; randomized here
        # (deterministically) so the test is non-degenerate.
        "cls": rnd((1, 1, dim)),
        "fc_w": rndw((dim, num_classes)),
        "fc_b": rnd((num_classes,)),
        "layers": [],
    }
    for _ in range(depth):
        params["layers"].append({
            "in_proj_w": rndw((dim, 3 * dim)),    # (in, out) = in_proj_weight^T
            "in_proj_b": rnd((3 * dim,)),
            "out_proj_w": rndw((dim, dim)),
            "out_proj_b": rnd((dim,)),
            "lin1_w": rndw((dim, mlp_dim)),
            "lin1_b": rnd((mlp_dim,)),
            "lin2_w": rndw((mlp_dim, dim)),
            "lin2_b": rnd((dim,)),
            "ln1_g": jnp.ones((dim,), jnp.float32),
            "ln1_b": jnp.zeros((dim,), jnp.float32),
            "ln2_g": jnp.ones((dim,), jnp.float32),
            "ln2_b": jnp.zeros((dim,), jnp.float32),
        })
    return params


# -------------------------------- forward ----------------------------------

def vit_forward(params, x, *, patch_size, heads, use_pallas=True):
    lin = linear if use_pallas else _linear_ref
    lin_ln = linear_add_layernorm if use_pallas else _linear_add_ln_ref
    att = attention if use_pallas else _attn_ref

    B, C, H, W = x.shape
    P = patch_size
    h, w = H // P, W // P
    D = params["patch_w"].shape[1]

    # rearrange 'b c (p1 h) (p2 w) -> b (h w) (p1 p2 c)', p1=p2=patch_size
    xr = (x.reshape(B, C, P, h, P, w)
           .transpose(0, 3, 5, 2, 4, 1)
           .reshape(B, h * w, P * P * C)).astype(jnp.bfloat16)

    emb = lin(xr.reshape(B * h * w, P * P * C),
              params["patch_w"], params["patch_b"]).reshape(B, h * w, D)
    cls = jnp.broadcast_to(params["cls"].astype(jnp.bfloat16), (B, 1, D))
    tokens = jnp.concatenate([cls, emb], axis=1)      # (B, T, D) bf16

    # batch_first=False transformer fed with (B, T, D):
    # sequence axis L = B (images), transformer batch N = T (tokens).
    L, N, _ = tokens.shape
    hd = D // heads
    scale = 1.0 / (hd ** 0.5)

    # Pad the token (transformer-batch) axis to a multiple of 8 so matmul /
    # attention tiles stay sublane-aligned.  Padded tokens are independent
    # rows (attention batches over tokens) and are dropped at the classifier.
    N_pad = ((N + 7) // 8) * 8
    if N_pad != N:
        tokens = jnp.pad(tokens, ((0, 0), (0, N_pad - N), (0, 0)))

    src = tokens.reshape(L * N_pad, D)                # flat (L, N)-major, bf16
    for lp in params["layers"]:
        # ---- self-attention (post-norm); no wrapper transposes ----
        qkv = lin(src, lp["in_proj_w"], lp["in_proj_b"])        # (L*Np, 3D)
        attn = att(qkv.reshape(L, N_pad, 3 * D), heads, scale)  # (L, Np, D)
        # fused out_proj + residual-add + LayerNorm
        src = lin_ln(attn.reshape(L * N_pad, D),
                     lp["out_proj_w"], lp["out_proj_b"], src,
                     lp["ln1_g"], lp["ln1_b"])

        # ---- MLP (ReLU), fused lin2 + residual-add + LayerNorm ----
        hidden = lin(src, lp["lin1_w"], lp["lin1_b"], relu=True)
        src = lin_ln(hidden, lp["lin2_w"], lp["lin2_b"], src,
                     lp["ln2_g"], lp["ln2_b"])

    cls_out = src.reshape(L, N_pad, D)[:, 0]          # x[:, 0] -> (B, D)
    return lin(cls_out, params["fc_w"], params["fc_b"], out_dtype=jnp.float32)


# ---------------------------------- main ------------------------------------

if __name__ == "__main__":
    # Small config consistent with the module structure
    # (image_size % patch_size == 0, dim % heads == 0).
    patch_size = 4
    image_size = 16
    dim = 32
    heads = 4
    depth = 2
    mlp_dim = 64
    num_classes = 12
    B, C = 2, 3
    patch_dim = C * patch_size ** 2
    assert dim % heads == 0

    key = jax.random.PRNGKey(0)
    kx, kp = jax.random.split(key)
    x = jax.random.normal(kx, (B, C, image_size, image_size), dtype=jnp.float32)
    params = init_params(kp, patch_dim=patch_dim, dim=dim, heads=heads,
                         depth=depth, mlp_dim=mlp_dim, num_classes=num_classes)

    out = vit_forward(params, x, patch_size=patch_size, heads=heads,
                      use_pallas=True)
    out = jax.block_until_ready(out)
    assert out.shape == (B, num_classes)

    ref = vit_forward(params, x, patch_size=patch_size, heads=heads,
                      use_pallas=False)
    ref = jax.block_until_ready(ref)
    # bf16 activations + bf16 MXU operands + approx reciprocal in softmax ->
    # slightly looser tolerance than an fp32 pipeline.
    assert jnp.allclose(out, ref, atol=2e-2, rtol=2e-2), \
        float(jnp.max(jnp.abs(out - ref)))

    print("KERNEL_OK")
</pallas_src>

<mosaic_0001>
module attributes {stable_mosaic.version = 11 : i64} {
  func.func @_linear_kernel(%arg0: i32, %arg1: i32, %arg2: i32, %arg3: memref<32x48xbf16, #tpu.memory_space<vmem>>, %arg4: memref<48x32xbf16, #tpu.memory_space<vmem>>, %arg5: memref<1x32xf32, #tpu.memory_space<vmem>>, %arg6: memref<32x32xbf16, #tpu.memory_space<vmem>>, %arg7: memref<32x32xf32, #tpu.memory_space<vmem>>) attributes {dimension_semantics = [#tpu.dimension_semantics<parallel>, #tpu.dimension_semantics<parallel>, #tpu.dimension_semantics<arbitrary>], iteration_bounds = array<i64: 1, 1, 1>, scalar_prefetch = 0 : i64, scratch_operands = 1 : i64, tpu.core_type = #tpu.core_type<tc>, window_params = [{transform_indices = @transform_0, window_bounds = array<i64: 32, 48>}, {transform_indices = @transform_1, window_bounds = array<i64: 48, 32>}, {transform_indices = @transform_2, window_bounds = array<i64: 1, 32>}, {transform_indices = @transform_3, window_bounds = array<i64: 32, 32>}]} {
    %c0_i32 = arith.constant 0 : i32
    %0 = arith.cmpi eq, %arg2, %c0_i32 : i32
    %1 = arith.extui %0 : i1 to i32
    %c0_i32_0 = arith.constant 0 : i32
    %2 = arith.cmpi ne, %1, %c0_i32_0 : i32
    scf.if %2 {
      %cst_10 = arith.constant 0.000000e+00 : f32
      %12 = vector.broadcast %cst_10 : f32 to vector<32x32xf32>
      %c0_11 = arith.constant 0 : index
      %c0_12 = arith.constant 0 : index
      %13 = vector.load %arg7[%c0_11, %c0_12] : memref<32x32xf32, #tpu.memory_space<vmem>>, vector<32x32xf32>
      tpu.vector_store %arg7[%c0_11, %c0_12], %12 {strides = array<i32>} : memref<32x32xf32, #tpu.memory_space<vmem>>, vector<32x32xf32>,
    } else {
    }
    %c0 = arith.constant 0 : index
    %c0_1 = arith.constant 0 : index
    %3 = vector.load %arg7[%c0, %c0_1] : memref<32x32xf32, #tpu.memory_space<vmem>>, vector<32x32xf32>
    %c0_2 = arith.constant 0 : index
    %c0_3 = arith.constant 0 : index
    %4 = vector.load %arg3[%c0_2, %c0_3] : memref<32x48xbf16, #tpu.memory_space<vmem>>, vector<32x48xbf16>
    %c0_4 = arith.constant 0 : index
    %c0_5 = arith.constant 0 : index
    %5 = vector.load %arg4[%c0_4, %c0_5] : memref<48x32xbf16, #tpu.memory_space<vmem>>, vector<48x32xbf16>
    %cst = arith.constant dense<0.000000e+00> : vector<32x32xf32>
    %6 = tpu.matmul %4, %5, %cst {dimension_numbers = #tpu.dot_dimension_numbers<[1], [0], [0], [1], [0, 0, 1, 1], [], []>} : vector<32x48xbf16>, vector<48x32xbf16>, vector<32x32xf32> -> vector<32x32xf32>
    %7 = arith.addf %3, %6 : vector<32x32xf32>
    %c0_6 = arith.constant 0 : index
    %c0_7 = arith.constant 0 : index
    %8 = vector.load %arg7[%c0_6, %c0_7] : memref<32x32xf32, #tpu.memory_space<vmem>>, vector<32x32xf32>
    tpu.vector_store %arg7[%c0_6, %c0_7], %7 {strides = array<i32>} : memref<32x32xf32, #tpu.memory_space<vmem>>, vector<32x32xf32>,
    %c0_i32_8 = arith.constant 0 : i32
    %9 = arith.cmpi eq, %arg2, %c0_i32_8 : i32
    %10 = arith.extui %9 : i1 to i32
    %c0_i32_9 = arith.constant 0 : i32
    %11 = arith.cmpi ne, %10, %c0_i32_9 : i32
    scf.if %11 {
      %c0_10 = arith.constant 0 : index
      %c0_11 = arith.constant 0 : index
      %12 = vector.load %arg7[%c0_10, %c0_11] : memref<32x32xf32, #tpu.memory_space<vmem>>, vector<32x32xf32>
      %c0_12 = arith.constant 0 : index
      %c0_13 = arith.constant 0 : index
      %13 = vector.load %arg5[%c0_12, %c0_13] : memref<1x32xf32, #tpu.memory_space<vmem>>, vector<1x32xf32>
      %14 = vector.broadcast %13 : vector<1x32xf32> to vector<32x32xf32>
      %15 = arith.addf %12, %14 : vector<32x32xf32>
      %16 = arith.truncf %15 : vector<32x32xf32> to vector<32x32xbf16>
      %c0_14 = arith.constant 0 : index
      %c0_15 = arith.constant 0 : index
      %17 = vector.load %arg6[%c0_14, %c0_15] : memref<32x32xbf16, #tpu.memory_space<vmem>>, vector<32x32xbf16>
      tpu.vector_store %arg6[%c0_14, %c0_15], %16 {strides = array<i32>} : memref<32x32xbf16, #tpu.memory_space<vmem>>, vector<32x32xbf16>,
    } else {
    }
    return
  }
  func.func @transform_0(%arg0: i32, %arg1: i32, %arg2: i32) -> (i32, i32) {
    %c0_i32 = arith.constant 0 : i32
    return %arg0, %arg2 : i32, i32
  }
  func.func @transform_1(%arg0: i32, %arg1: i32, %arg2: i32) -> (i32, i32) {
    %c0_i32 = arith.constant 0 : i32
    return %arg2, %arg1 : i32, i32
  }
  func.func @transform_2(%arg0: i32, %arg1: i32, %arg2: i32) -> (i32, i32) {
    %c0_i32 = arith.constant 0 : i32
    %c0_i32_0 = arith.constant 0 : i32
    return %c0_i32, %arg1 : i32, i32
  }
  func.func @transform_3(%arg0: i32, %arg1: i32, %arg2: i32) -> (i32, i32) {
    %c0_i32 = arith.constant 0 : i32
    return %arg0, %arg1 : i32, i32
  }
}

</mosaic_0001>

<bundles_post_ra>
// kernel: tpu_custom_call.1
= control target key start
LH: loop header
LB: loop body
LE: loop exit
PB: predicated region body
PF: predicated region fallthrough
CT: control target
= control target key end

     0   :  { %vm20_vm0 = vcmask 261120   ;;  %vm67_vm1 = vcmask 392192   ;;  %v251_v3 = vmov 0.0   ;;  %s315_s0 = inlined_call_operand.vmem [shape: bf16[32,48], index: 0, kind: input, shape index: {}]   ;;  %s316_s1 = inlined_call_operand.vmem [shape: bf16[48,32], index: 1, kind: input, shape index: {}]   ;;  %s317_s2 = inlined_call_operand.vmem [shape: f32[1,32], index: 2, kind: input, shape index: {}]   ;;  %s318_s3 = inlined_call_operand.hbm [shape: bf16[32,32], index: 3, kind: output, shape index: {}]  }
   0x1   :  { %v222_v0 = vld [vmem:[%s316_s1] sm:$0xff]   ;;  %v223_v1 = vld [vmem:[%s316_s1 + $0x8] sm:$0xff]   ;;  %23 = vst.msk [vmem:[#allocation2 + $0x10] sm:$0xff] %vm20_vm0, %v251_v3  ;;  %21 = vst.msk [vmem:[#allocation2] sm:$0xff] %vm20_vm0, %v251_v3 }
   0x2   :  { %208 = vmatprep.subr.bf16.mxu0 %v222_v0  ;;  %v225_v2 = vld [vmem:[%s315_s0] sm:$0xff]   ;;  %22 = vst.msk [vmem:[#allocation2 + $0x8] sm:$0xff] %vm20_vm0, %v251_v3  ;;  %24 = vst.msk [vmem:[#allocation2 + $0x18] sm:$0xff] %vm20_vm0, %v251_v3  ;;  %v224_v4 = vld [vmem:[%s316_s1 + $0x10] sm:$0xff]  }
   0x3   :  { %209 = vmatpush3.bf16.msra.mxu0 %v222_v0  ;;  %214 = vmatprep.mubr.msk.bf16.mxu0 %vm67_vm1, %v225_v2 }
   0x4   :  { %210 = vmatprep.subr.bf16.mxu0 %v223_v1 }
   0x5   :  { %8 = vsyncpa [#allocation4], 0  ;;  %v226_v5 = vld [vmem:[%s315_s0 + $0x8] sm:$0xff]   ;;  %v194_v18 = vld [vmem:[%s317_s2] ss:$0 sm:$0xff]  ;;  %vm166_vm2 = vcmask 257024  }
   0x6   :  { %s252_s22 = smov [#allocation3]  }
   0x7   :  { %211 = vmatpush3.bf16.msra.mxu0 %v223_v1  ;;  %s176_s23 = sshll.u32 %s252_s22, 4  ;;  %s177_s23 = int_to_ptr.vmem [resolvable:$true] %s176_s23 }
   0x8   :  { %212 = vmatprep.subr.bf16.mxu0 %v224_v4  ;;  %v27_v6 = vld [vmem:[#allocation2 + $0x10] sm:$0xff]  ;;  %v25_v7 = vld [vmem:[#allocation2] sm:$0xff]  ;;  %s227_s2 = scalar_lea.vmem %s177_s23, 256  ;;  %p232_p1 = scmp.lt.s32.totalorder %s177_s23, %s177_s23 }
   0x9   :  { %v28_v9 = vld [vmem:[#allocation2 + $0x18] sm:$0xff]  ;;  %v26_v12 = vld [vmem:[#allocation2 + $0x8] sm:$0xff]  ;;  %p228_p0 = scmp.ne.s32.totalorder %s177_s23, %s227_s2  ;;  %p233_p2 = scmp.lt.s32.totalorder %s227_s2, %s227_s2 }
   0xb   :  { %213 = vmatpush3.bf16.msra.mxu0 %v224_v4  ;;  %p234_p3 = por %p233_p2, %p232_p1 }
   0xd   :  { %p235_p4 = pnand %p234_p3, %p228_p0 }
   0xe   :  { %215 = vmatmul.mubr.msk.bf16.vlgmr.msra.gmra.mrb[0].mxu0 %vm67_vm1, %v226_v5 }
  0xe1   :  { %v216_v8 = vpop.f32.mrb[0].mxu0 }
  0xe2   :  { %v125_v10 = vadd.f32 %v216_v8, %v27_v6  ;;  %v108_v11 = vpop.f32.mrb[1].mxu0 }
  0xe3   :  { %v123_v13 = vadd.f32 %v108_v11, %v25_v7  ;;  %v217_v14 = vpop.f32.mrb[2].mxu0 }
  0xe4   :  { %130 = vst.msk [vmem:[#allocation2 + $0x10] sm:$0xff] %vm20_vm0, %v125_v10  ;;  %v126_v15 = vadd.f32 %v217_v14, %v28_v9  ;;  %v111_v16 = vpop.f32.mrb[3].mxu0 }
  0xe5   :  { %128 = vst.msk [vmem:[#allocation2] sm:$0xff] %vm20_vm0, %v123_v13  ;;  %v124_v17 = vadd.f32 %v111_v16, %v26_v12 }
  0xe6   :  { %131 = vst.msk [vmem:[#allocation2 + $0x18] sm:$0xff] %vm20_vm0, %v126_v15 }
  0xe7   :  { %129 = vst.msk [vmem:[#allocation2 + $0x8] sm:$0xff] %vm20_vm0, %v124_v17 }
  0xeb   :  { %v137_v19 = vld [vmem:[#allocation2 + $0x10] sm:$0xff] }
  0xec   :  { %v135_v20 = vld [vmem:[#allocation2] sm:$0xff]  ;;  %v148_v21 = vadd.f32 %v194_v18, %v137_v19 }
  0xed   :  { %v138_v22 = vld [vmem:[#allocation2 + $0x18] sm:$0xff]  ;;  %v146_v23 = vadd.f32 %v194_v18, %v135_v20 }
  0xee   :  { %v136_v24 = vld [vmem:[#allocation2 + $0x8] sm:$0xff]  ;;  %v149_v25 = vadd.f32 %v194_v18, %v138_v22  ;;  %v201_v26 = vpack.c.bf16 %v148_v21, %v148_v21 }
  0xef   :  { %v147_v27 = vadd.f32 %v194_v18, %v136_v24  ;;  %v199_v28 = vpack.c.bf16 %v146_v23, %v146_v23 }
  0xf0   :  { %v202_v29 = vpack.c.bf16 %v149_v25, %v149_v25  ;;  %169 = vst.msk [vmem:[#allocation3 + $0x8] sm:$0xf] %vm166_vm2, %v201_v26 }
  0xf1   :  { %v200_v30 = vpack.c.bf16 %v147_v27, %v147_v27  ;;  %167 = vst.msk [vmem:[#allocation3] sm:$0xf] %vm166_vm2, %v199_v28 }
  0xf2   :  { %170 = vst.msk [vmem:[#allocation3 + $0xc] sm:$0xf] %vm166_vm2, %v202_v29 }
  0xf3   :  { %168 = vst.msk [vmem:[#allocation3 + $0x4] sm:$0xf] %vm166_vm2, %v200_v30 }
  0xf4   :  { %238 = shalt.err (!%p235_p4)
}
  0xf5   :  { %s239_s26 = scalar_lea.hbm %s318_s3, 256 }
  0xf6   :  { %p240_p5 = scmp.ne.s32.totalorder %s318_s3, %s239_s26  ;;  %p243_p6 = scmp.lt.u32.totalorder %s239_s26, %s318_s3 }
  0xf8   :  { %p245_p7 = pnand %p243_p6, %p240_p5 }
  0xfa   :  { %248 = shalt.err (!%p245_p7)
}
  0xfb   :  { %s253_s4 = smov 64   ;;  %s254_s5 = smov 4  }
  0xfc   :  { %182 = dma.vmem_to_hbm [thread:$0]  %s177_s23, 256, %s318_s3, [#allocation4], %s253_s4, %s253_s4, %s254_s5  }
  0xfd   :  { %249 = dma.done.wait [#allocation4], 256  }
  0xfe   :  { %250 = vsyncadd [#allocation4], 4294967040 }
  0xff   :  { %186 = vsyncpa [#allocation4], 1 }

</bundles_post_ra>
